<compile_context>
chip_gen: v6e
topology: v6e:2x2x1
jax: 0.10.0
libtpu: 0.0.40
codegen_flags: <defaults>
</compile_context>

<pallas_src>
import functools

import jax
import jax.numpy as jnp
import numpy as np
from jax.experimental import pallas as pl
from jax.experimental.pallas import tpu as pltpu


_TARGET_TILE_BYTES = 4 << 20   # f32 logprobs bytes per tile (amortizes ~0.35 us/step)
_MAX_TILE_BYTES = 8 << 20      # hard cap so double-buffered inputs + temps fit VMEM


def _num_tensorcores():
    """TensorCores per device: 1 on v5e/v6e, >1 on multi-TC chips (e.g. v7x)."""
    try:
        info = pltpu.get_tpu_info()
        for name in ("num_cores", "core_count", "num_tensorcores", "tensorcore_count"):
            n = getattr(info, name, None)
            if isinstance(n, int) and n >= 1:
                return n
    except Exception:
        pass
    try:
        n = getattr(jax.devices()[0], "num_cores", None)
        if isinstance(n, int) and n >= 1:
            return n
    except Exception:
        pass
    return 1


def _pick_tiles(B, V):
    """Row/col tile sizes targeting ~4 MiB of f32 logprobs per tile.

    Rows are a multiple of 32 (8-bit mask sublane packing); columns are a
    multiple of 128 unless the block spans the full V.
    """
    f32 = 4
    if 32 * V * f32 <= _MAX_TILE_BYTES:
        ct = V                                                     # full lane width
    else:
        ct = max(128, (_TARGET_TILE_BYTES // (32 * f32)) // 128 * 128)
    rt = (_TARGET_TILE_BYTES // (ct * f32)) // 32 * 32
    b32 = ((B + 31) // 32) * 32
    rt = int(min(max(32, rt), b32))
    return rt, int(ct)


def _multi_nll_kernel(logp_ref, mask_ref, out_ref, *scratch,
                      ls, rows, cols, row_chunks):
    """Row/col-tiled accumulation kernel.

    logp_ref : (row_tile, col_tile) logprobs tile (any float dtype, upcast to f32)
    mask_ref : (row_tile, col_tile) bool / integer {0,1} tile
    out_ref  : (1, 8, 128) per-core-split partials;
               [0,0,0]=sum of per-row means, [0,0,1]=non-empty row count,
               [0,0,2]=sum of all logprobs (only populated when ls > 0)
    scratch  : (rs, rc, [ra,] gs, gc[, ga]) -- (row_tile, 1) f32 VMEM accumulators.
               rs/rc/ra are per-row-tile (reset each row tile), gs/gc/ga are
               per-core-split running totals.
    """
    if ls > 0.0:
        rs, rc, ra, gs, gc, ga = scratch
    else:
        rs, rc, gs, gc = scratch
        ra = ga = None

    s = pl.program_id(0)
    i = pl.program_id(1)
    j = pl.program_id(2)
    n_i = pl.num_programs(1)
    n_j = pl.num_programs(2)

    row_tile, col_tile = logp_ref.shape

    @pl.when((i == 0) & (j == 0))
    def _init_split():
        gs[...] = jnp.zeros_like(gs)
        gc[...] = jnp.zeros_like(gc)
        if ls > 0.0:
            ga[...] = jnp.zeros_like(ga)

    @pl.when(j == 0)
    def _init_row_tile():
        rs[...] = jnp.zeros_like(rs)
        rc[...] = jnp.zeros_like(rc)
        if ls > 0.0:
            ra[...] = jnp.zeros_like(ra)

    # Logical (unclamped) tile indices. The in_spec index_map clamps the DMA so it
    # never reads a block starting past the array; rows/cols beyond the logical
    # extent are garbage in VMEM and are masked out on the (rare) ragged tiles.
    tile_idx = s * row_chunks + i
    row0 = tile_idx * row_tile
    col0 = j * col_tile
    ragged = (row0 + row_tile > rows) | (col0 + col_tile > cols)

    lp = logp_ref[...].astype(jnp.float32)
    m = mask_ref[...]
    keep_full = m if m.dtype == jnp.bool_ else (m != 0)

    def accumulate(keep, lp_valid):
        # masked_fill(~mask, 0) == select(mask, logprobs, 0); count via select too
        rs[...] += jnp.sum(jnp.where(keep, lp_valid, 0.0), axis=-1, keepdims=True)
        rc[...] += jnp.sum(jnp.where(keep, 1.0, 0.0), axis=-1, keepdims=True)
        if ls > 0.0:
            ra[...] += jnp.sum(lp_valid, axis=-1, keepdims=True)

    @pl.when(jnp.logical_not(ragged))
    def _interior():      # fast path: no validity masking on full tiles
        accumulate(keep_full, lp)

    @pl.when(ragged)
    def _edge():          # ragged last row/col tile or duplicated clamp tile
        r = jax.lax.broadcasted_iota(jnp.int32, (row_tile, 1), 0)
        c = jax.lax.broadcasted_iota(jnp.int32, (1, col_tile), 1)
        valid = ((row0 + r) < rows) & ((col0 + c) < cols)
        accumulate(keep_full & valid, jnp.where(valid, lp, 0.0))

    @pl.when(j == n_j - 1)
    def _fold_row_tile():
        cnt = rc[...]
        nonempty = cnt > 0.0
        gs[...] += jnp.where(nonempty, rs[...] / jnp.where(nonempty, cnt, 1.0), 0.0)
        gc[...] += jnp.where(nonempty, 1.0, 0.0)
        if ls > 0.0:
            ga[...] += ra[...]

    @pl.when((i == n_i - 1) & (j == n_j - 1))
    def _finalize():
        tot_sum = jnp.sum(gs[...])
        tot_cnt = jnp.sum(gc[...])
        tot_all = jnp.sum(ga[...]) if ls > 0.0 else jnp.float32(0.0)
        sub = jax.lax.broadcasted_iota(jnp.int32, (1, 8, 128), 1)
        lane = jax.lax.broadcasted_iota(jnp.int32, (1, 8, 128), 2)
        first = sub == 0
        out_ref[...] = jnp.where(first & (lane == 0), tot_sum,
                       jnp.where(first & (lane == 1), tot_cnt,
                       jnp.where(first & (lane == 2), tot_all, 0.0)))


def multi_nll_loss(logprobs, target_mask, label_smoothing=0.0,
                   row_tile=None, col_tile=None):
    """Pallas TPU implementation of MultiNLLLoss.forward.

    logprobs may be f32 or bf16 (bf16 halves the dominant HBM stream; the kernel
    upcasts to f32 internally). target_mask is consumed as-is (bool recommended:
    8-bit storage, no wrapper-side materialization).
    """
    B, V = logprobs.shape
    ls = float(label_smoothing)

    rt_auto, ct_auto = _pick_tiles(B, V)
    rt = rt_auto if row_tile is None else max(32, ((int(row_tile) + 31) // 32) * 32)
    if col_tile is None:
        ct = ct_auto
    else:
        ct = int(col_tile)
        if ct != V:
            ct = max(128, (ct // 128) * 128)          # lane blocks must be 128-multiples
        ct = min(ct, ((V + 127) // 128) * 128)

    total_row_tiles = pl.cdiv(B, rt)
    col_chunks = pl.cdiv(V, ct)

    n_tc = _num_tensorcores()
    n_splits = max(1, min(n_tc, total_row_tiles))     # 1 on v5e/v6e; per-TC on v7x
    row_chunks = pl.cdiv(total_row_tiles, n_splits)

    def in_map(s, i, j):
        # Clamp so the DMA never reads a block starting past the array; the kernel
        # masks those rows/cols via the *unclamped* logical indices.
        t = jnp.minimum(s * row_chunks + i, total_row_tiles - 1)
        return (t, j)

    kernel = functools.partial(_multi_nll_kernel, ls=ls, rows=B, cols=V,
                               row_chunks=row_chunks)

    n_scratch = 6 if ls > 0.0 else 4                  # drop smoothing accumulators at ls==0
    lead_sem = pltpu.CORE_PARALLEL if n_splits > 1 else pltpu.ARBITRARY

    partials = pl.pallas_call(
        kernel,
        out_shape=jax.ShapeDtypeStruct((n_splits, 8, 128), jnp.float32),
        grid_spec=pltpu.PrefetchScalarGridSpec(
            num_scalar_prefetch=0,
            grid=(n_splits, row_chunks, col_chunks),
            in_specs=[
                pl.BlockSpec((rt, ct), in_map),
                pl.BlockSpec((rt, ct), in_map),
            ],
            out_specs=pl.BlockSpec((1, 8, 128), lambda s, i, j: (s, 0, 0)),
            scratch_shapes=[pltpu.VMEM((rt, 1), jnp.float32)] * n_scratch,
        ),
        compiler_params=pltpu.CompilerParams(
            dimension_semantics=(lead_sem, pltpu.ARBITRARY, pltpu.ARBITRARY),
            vmem_limit_bytes=48 * 1024 * 1024,
        ),
    )(logprobs, target_mask)

    sums = partials[:, 0, 0]
    cnts = partials[:, 0, 1]
    loss = -(jnp.sum(sums) / jnp.sum(cnts))
    if ls > 0.0:
        smooth = -(jnp.sum(partials[:, 0, 2]) / float(B * V))
        return ls * smooth + (1.0 - ls) * loss
    return loss


def multi_nll_loss_ref(logprobs, target_mask, label_smoothing=0.0):
    """Pure-JAX reference matching the PyTorch module."""
    lp = logprobs.astype(jnp.float32)
    m = target_mask
    smooth_loss = -jnp.mean(jnp.mean(lp, axis=-1))
    masked = jnp.where(m, lp, 0.0)
    cnt = jnp.sum(m.astype(jnp.float32), axis=-1)
    nonempty = cnt > 0
    per_row = jnp.where(nonempty, jnp.sum(masked, axis=-1) / jnp.where(nonempty, cnt, 1.0), 0.0)
    loss = -jnp.sum(per_row) / jnp.sum(nonempty.astype(jnp.float32))
    ls = label_smoothing
    if ls > 0:
        return ls * smooth_loss + (1.0 - ls) * loss
    return loss


if __name__ == "__main__":
    key = jax.random.PRNGKey(0)
    k1, k2, k3, k4, k5, k6 = jax.random.split(key, 6)

    # --- small case: single ragged row tile, ls>0 and ls==0 paths ---
    B, V = 8, 128
    logprobs = jax.nn.log_softmax(jax.random.normal(k1, (B, V), dtype=jnp.float32), axis=-1)
    mask = jax.random.bernoulli(k2, p=0.05, shape=(B, V))
    mask = mask.at[0, :3].set(True)        # guaranteed non-empty row
    mask = mask.at[B - 1, :].set(False)    # guaranteed empty row

    out = jax.block_until_ready(multi_nll_loss(logprobs, mask, label_smoothing=0.1))
    ref = multi_nll_loss_ref(logprobs, mask, label_smoothing=0.1)
    assert np.allclose(np.asarray(out), np.asarray(ref), rtol=1e-5, atol=1e-5), (
        f"mismatch (small, ls=0.1): kernel={out} ref={ref}")

    out0 = jax.block_until_ready(multi_nll_loss(logprobs, mask, label_smoothing=0.0))
    ref0 = multi_nll_loss_ref(logprobs, mask, label_smoothing=0.0)
    assert np.allclose(np.asarray(out0), np.asarray(ref0), rtol=1e-5, atol=1e-5), (
        f"mismatch (small, ls=0): kernel={out0} ref={ref0}")

    # --- multi row-tile case: ragged last row tile + clamped overflow handling ---
    B2, V2 = 300, 128
    lp2 = jax.nn.log_softmax(jax.random.normal(k3, (B2, V2), dtype=jnp.float32), axis=-1)
    m2 = jax.random.bernoulli(k4, p=0.05, shape=(B2, V2))
    m2 = m2.at[0, :3].set(True)
    m2 = m2.at[17, :].set(False)

    out2 = jax.block_until_ready(multi_nll_loss(lp2, m2, label_smoothing=0.2, row_tile=64))
    ref2 = multi_nll_loss_ref(lp2, m2, label_smoothing=0.2)
    assert np.allclose(np.asarray(out2), np.asarray(ref2), rtol=1e-5, atol=1e-5), (
        f"mismatch (multi row-tile): kernel={out2} ref={ref2}")

    # --- column-tiling path: ragged rows AND ragged columns ---
    B3, V3 = 40, 200
    lp3 = jax.nn.log_softmax(jax.random.normal(k5, (B3, V3), dtype=jnp.float32), axis=-1)
    m3 = jax.random.bernoulli(k6, p=0.05, shape=(B3, V3))
    m3 = m3.at[0, :3].set(True)
    m3 = m3.at[5, :].set(False)

    out3 = jax.block_until_ready(
        multi_nll_loss(lp3, m3, label_smoothing=0.1, row_tile=32, col_tile=128))
    ref3 = multi_nll_loss_ref(lp3, m3, label_smoothing=0.1)
    assert np.allclose(np.asarray(out3), np.asarray(ref3), rtol=1e-5, atol=1e-5), (
        f"mismatch (col-tiled): kernel={out3} ref={ref3}")

    # --- bf16 logprobs stream (kernel upcasts to f32 internally) ---
    lp4 = lp2.astype(jnp.bfloat16)
    out4 = jax.block_until_ready(multi_nll_loss(lp4, m2, label_smoothing=0.1, row_tile=64))
    ref4 = multi_nll_loss_ref(lp4, m2, label_smoothing=0.1)
    assert np.allclose(np.asarray(out4), np.asarray(ref4), rtol=2e-4, atol=2e-4), (
        f"mismatch (bf16): kernel={out4} ref={ref4}")

    print("KERNEL_OK")
</pallas_src>

<mosaic_0001>
module attributes {stable_mosaic.version = 11 : i64} {
  func.func @_multi_nll_kernel(%arg0: i32, %arg1: i32, %arg2: i32, %arg3: memref<32x128xf32, #tpu.memory_space<vmem>>, %arg4: memref<32x128xi32, #tpu.memory_space<vmem>>, %arg5: memref<1x8x128xf32, #tpu.memory_space<vmem>>, %arg6: memref<32x1xf32, #tpu.memory_space<vmem>>, %arg7: memref<32x1xf32, #tpu.memory_space<vmem>>, %arg8: memref<32x1xf32, #tpu.memory_space<vmem>>, %arg9: memref<32x1xf32, #tpu.memory_space<vmem>>, %arg10: memref<32x1xf32, #tpu.memory_space<vmem>>, %arg11: memref<32x1xf32, #tpu.memory_space<vmem>>) attributes {dimension_semantics = [#tpu.dimension_semantics<arbitrary>, #tpu.dimension_semantics<arbitrary>, #tpu.dimension_semantics<arbitrary>], iteration_bounds = array<i64: 1, 1, 1>, scalar_prefetch = 0 : i64, scratch_operands = 6 : i64, tpu.core_type = #tpu.core_type<tc>, window_params = [{transform_indices = @transform_0, window_bounds = array<i64: 32, 128>}, {transform_indices = @transform_1, window_bounds = array<i64: 32, 128>}, {transform_indices = @transform_2, window_bounds = array<i64: 1, 8, 128>}]} {
    %c0_i32 = arith.constant 0 : i32
    %0 = arith.cmpi eq, %arg1, %c0_i32 : i32
    %c0_i32_0 = arith.constant 0 : i32
    %1 = arith.cmpi eq, %arg2, %c0_i32_0 : i32
    %2 = arith.andi %0, %1 : i1
    %3 = arith.extui %2 : i1 to i32
    %c0_i32_1 = arith.constant 0 : i32
    %4 = arith.cmpi ne, %3, %c0_i32_1 : i32
    scf.if %4 {
      %cst_17 = arith.constant 0.000000e+00 : f32
      %33 = vector.broadcast %cst_17 : f32 to vector<32x1xf32>
      %c0_18 = arith.constant 0 : index
      %c0_19 = arith.constant 0 : index
      %34 = vector.load %arg9[%c0_18, %c0_19] : memref<32x1xf32, #tpu.memory_space<vmem>>, vector<32x1xf32>
      tpu.vector_store %arg9[%c0_18, %c0_19], %33 {strides = array<i32>} : memref<32x1xf32, #tpu.memory_space<vmem>>, vector<32x1xf32>,
      %cst_20 = arith.constant 0.000000e+00 : f32
      %35 = vector.broadcast %cst_20 : f32 to vector<32x1xf32>
      %c0_21 = arith.constant 0 : index
      %c0_22 = arith.constant 0 : index
      %36 = vector.load %arg10[%c0_21, %c0_22] : memref<32x1xf32, #tpu.memory_space<vmem>>, vector<32x1xf32>
      tpu.vector_store %arg10[%c0_21, %c0_22], %35 {strides = array<i32>} : memref<32x1xf32, #tpu.memory_space<vmem>>, vector<32x1xf32>,
      %cst_23 = arith.constant 0.000000e+00 : f32
      %37 = vector.broadcast %cst_23 : f32 to vector<32x1xf32>
      %c0_24 = arith.constant 0 : index
      %c0_25 = arith.constant 0 : index
      %38 = vector.load %arg11[%c0_24, %c0_25] : memref<32x1xf32, #tpu.memory_space<vmem>>, vector<32x1xf32>
      tpu.vector_store %arg11[%c0_24, %c0_25], %37 {strides = array<i32>} : memref<32x1xf32, #tpu.memory_space<vmem>>, vector<32x1xf32>,
    } else {
    }
    %c0_i32_2 = arith.constant 0 : i32
    %5 = arith.cmpi eq, %arg2, %c0_i32_2 : i32
    %6 = arith.extui %5 : i1 to i32
    %c0_i32_3 = arith.constant 0 : i32
    %7 = arith.cmpi ne, %6, %c0_i32_3 : i32
    scf.if %7 {
      %cst_17 = arith.constant 0.000000e+00 : f32
      %33 = vector.broadcast %cst_17 : f32 to vector<32x1xf32>
      %c0_18 = arith.constant 0 : index
      %c0_19 = arith.constant 0 : index
      %34 = vector.load %arg6[%c0_18, %c0_19] : memref<32x1xf32, #tpu.memory_space<vmem>>, vector<32x1xf32>
      tpu.vector_store %arg6[%c0_18, %c0_19], %33 {strides = array<i32>} : memref<32x1xf32, #tpu.memory_space<vmem>>, vector<32x1xf32>,
      %cst_20 = arith.constant 0.000000e+00 : f32
      %35 = vector.broadcast %cst_20 : f32 to vector<32x1xf32>
      %c0_21 = arith.constant 0 : index
      %c0_22 = arith.constant 0 : index
      %36 = vector.load %arg7[%c0_21, %c0_22] : memref<32x1xf32, #tpu.memory_space<vmem>>, vector<32x1xf32>
      tpu.vector_store %arg7[%c0_21, %c0_22], %35 {strides = array<i32>} : memref<32x1xf32, #tpu.memory_space<vmem>>, vector<32x1xf32>,
      %cst_23 = arith.constant 0.000000e+00 : f32
      %37 = vector.broadcast %cst_23 : f32 to vector<32x1xf32>
      %c0_24 = arith.constant 0 : index
      %c0_25 = arith.constant 0 : index
      %38 = vector.load %arg8[%c0_24, %c0_25] : memref<32x1xf32, #tpu.memory_space<vmem>>, vector<32x1xf32>
      tpu.vector_store %arg8[%c0_24, %c0_25], %37 {strides = array<i32>} : memref<32x1xf32, #tpu.memory_space<vmem>>, vector<32x1xf32>,
    } else {
    }
    %c1_i32 = arith.constant 1 : i32
    %8 = arith.muli %arg0, %c1_i32 : i32
    %9 = arith.addi %8, %arg1 : i32
    %c32_i32 = arith.constant 32 : i32
    %10 = arith.muli %9, %c32_i32 : i32
    %c128_i32 = arith.constant 128 : i32
    %11 = arith.muli %arg2, %c128_i32 : i32
    %c32_i32_4 = arith.constant 32 : i32
    %12 = arith.addi %10, %c32_i32_4 : i32
    %c8_i32 = arith.constant 8 : i32
    %13 = arith.cmpi sgt, %12, %c8_i32 : i32
    %c128_i32_5 = arith.constant 128 : i32
    %14 = arith.addi %11, %c128_i32_5 : i32
    %c128_i32_6 = arith.constant 128 : i32
    %15 = arith.cmpi sgt, %14, %c128_i32_6 : i32
    %16 = arith.ori %13, %15 : i1
    %c0 = arith.constant 0 : index
    %c0_7 = arith.constant 0 : index
    %17 = vector.load %arg3[%c0, %c0_7] : memref<32x128xf32, #tpu.memory_space<vmem>>, vector<32x128xf32>
    %c0_8 = arith.constant 0 : index
    %c0_9 = arith.constant 0 : index
    %18 = vector.load %arg4[%c0_8, %c0_9] : memref<32x128xi32, #tpu.memory_space<vmem>>, vector<32x128xi32>
    %cst = arith.constant dense<0> : vector<32x128xi32>
    %19 = arith.cmpi ne, %18, %cst : vector<32x128xi32>
    %true = arith.constant true
    %20 = arith.xori %16, %true : i1
    %21 = arith.extui %20 : i1 to i32
    %c0_i32_10 = arith.constant 0 : i32
    %22 = arith.cmpi ne, %21, %c0_i32_10 : i32
    scf.if %22 {
      %c0_17 = arith.constant 0 : index
      %c0_18 = arith.constant 0 : index
      %33 = vector.load %arg6[%c0_17, %c0_18] : memref<32x1xf32, #tpu.memory_space<vmem>>, vector<32x1xf32>
      %cst_19 = arith.constant 0.000000e+00 : f32
      %34 = vector.broadcast %cst_19 : f32 to vector<32x128xf32>
      %35 = arith.select %19, %17, %34 : vector<32x128xi1>, vector<32x128xf32>
      %cst_20 = arith.constant dense<0.000000e+00> : vector<32xf32>
      %36 = vector.multi_reduction <add>, %35, %cst_20 [1] : vector<32x128xf32> to vector<32xf32>
      %37 = vector.shape_cast %36 : vector<32xf32> to vector<32x1xf32>
      %38 = arith.addf %33, %37 : vector<32x1xf32>
      %c0_21 = arith.constant 0 : index
      %c0_22 = arith.constant 0 : index
      %39 = vector.load %arg6[%c0_21, %c0_22] : memref<32x1xf32, #tpu.memory_space<vmem>>, vector<32x1xf32>
      tpu.vector_store %arg6[%c0_21, %c0_22], %38 {strides = array<i32>} : memref<32x1xf32, #tpu.memory_space<vmem>>, vector<32x1xf32>,
      %c0_23 = arith.constant 0 : index
      %c0_24 = arith.constant 0 : index
      %40 = vector.load %arg7[%c0_23, %c0_24] : memref<32x1xf32, #tpu.memory_space<vmem>>, vector<32x1xf32>
      %cst_25 = arith.constant 1.000000e+00 : f32
      %cst_26 = arith.constant 0.000000e+00 : f32
      %41 = vector.broadcast %cst_25 : f32 to vector<32x128xf32>
      %42 = vector.broadcast %cst_26 : f32 to vector<32x128xf32>
      %43 = arith.select %19, %41, %42 : vector<32x128xi1>, vector<32x128xf32>
      %cst_27 = arith.constant dense<0.000000e+00> : vector<32xf32>
      %44 = vector.multi_reduction <add>, %43, %cst_27 [1] : vector<32x128xf32> to vector<32xf32>
      %45 = vector.shape_cast %44 : vector<32xf32> to vector<32x1xf32>
      %46 = arith.addf %40, %45 : vector<32x1xf32>
      %c0_28 = arith.constant 0 : index
      %c0_29 = arith.constant 0 : index
      %47 = vector.load %arg7[%c0_28, %c0_29] : memref<32x1xf32, #tpu.memory_space<vmem>>, vector<32x1xf32>
      tpu.vector_store %arg7[%c0_28, %c0_29], %46 {strides = array<i32>} : memref<32x1xf32, #tpu.memory_space<vmem>>, vector<32x1xf32>,
      %c0_30 = arith.constant 0 : index
      %c0_31 = arith.constant 0 : index
      %48 = vector.load %arg8[%c0_30, %c0_31] : memref<32x1xf32, #tpu.memory_space<vmem>>, vector<32x1xf32>
      %cst_32 = arith.constant dense<0.000000e+00> : vector<32xf32>
      %49 = vector.multi_reduction <add>, %17, %cst_32 [1] : vector<32x128xf32> to vector<32xf32>
      %50 = vector.shape_cast %49 : vector<32xf32> to vector<32x1xf32>
      %51 = arith.addf %48, %50 : vector<32x1xf32>
      %c0_33 = arith.constant 0 : index
      %c0_34 = arith.constant 0 : index
      %52 = vector.load %arg8[%c0_33, %c0_34] : memref<32x1xf32, #tpu.memory_space<vmem>>, vector<32x1xf32>
      tpu.vector_store %arg8[%c0_33, %c0_34], %51 {strides = array<i32>} : memref<32x1xf32, #tpu.memory_space<vmem>>, vector<32x1xf32>,
    } else {
    }
    %23 = arith.extui %16 : i1 to i32
    %c0_i32_11 = arith.constant 0 : i32
    %24 = arith.cmpi ne, %23, %c0_i32_11 : i32
    scf.if %24 {
      %33 = tpu.iota {dimensions = array<i32: 0>} : vector<32x1xi32>
      %34 = tpu.iota {dimensions = array<i32: 1>} : vector<1x128xi32>
      %35 = vector.broadcast %10 : i32 to vector<32x1xi32>
      %36 = arith.addi %35, %33 : vector<32x1xi32>
      %c8_i32_17 = arith.constant 8 : i32
      %37 = vector.broadcast %c8_i32_17 : i32 to vector<32x1xi32>
      %38 = arith.cmpi slt, %36, %37 : vector<32x1xi32>
      %39 = vector.broadcast %11 : i32 to vector<1x128xi32>
      %40 = arith.addi %39, %34 : vector<1x128xi32>
      %c128_i32_18 = arith.constant 128 : i32
      %41 = vector.broadcast %c128_i32_18 : i32 to vector<1x128xi32>
      %42 = arith.cmpi slt, %40, %41 : vector<1x128xi32>
      %43 = vector.broadcast %38 : vector<32x1xi1> to vector<32x128xi1>
      %44 = vector.broadcast %42 : vector<1x128xi1> to vector<32x128xi1>
      %45 = arith.andi %43, %44 : vector<32x128xi1>
      %46 = arith.andi %19, %45 : vector<32x128xi1>
      %cst_19 = arith.constant 0.000000e+00 : f32
      %47 = vector.broadcast %cst_19 : f32 to vector<32x128xf32>
      %48 = arith.select %45, %17, %47 : vector<32x128xi1>, vector<32x128xf32>
      %c0_20 = arith.constant 0 : index
      %c0_21 = arith.constant 0 : index
      %49 = vector.load %arg6[%c0_20, %c0_21] : memref<32x1xf32, #tpu.memory_space<vmem>>, vector<32x1xf32>
      %cst_22 = arith.constant 0.000000e+00 : f32
      %50 = vector.broadcast %cst_22 : f32 to vector<32x128xf32>
      %51 = arith.select %46, %48, %50 : vector<32x128xi1>, vector<32x128xf32>
      %cst_23 = arith.constant dense<0.000000e+00> : vector<32xf32>
      %52 = vector.multi_reduction <add>, %51, %cst_23 [1] : vector<32x128xf32> to vector<32xf32>
      %53 = vector.shape_cast %52 : vector<32xf32> to vector<32x1xf32>
      %54 = arith.addf %49, %53 : vector<32x1xf32>
      %c0_24 = arith.constant 0 : index
      %c0_25 = arith.constant 0 : index
      %55 = vector.load %arg6[%c0_24, %c0_25] : memref<32x1xf32, #tpu.memory_space<vmem>>, vector<32x1xf32>
      tpu.vector_store %arg6[%c0_24, %c0_25], %54 {strides = array<i32>} : memref<32x1xf32, #tpu.memory_space<vmem>>, vector<32x1xf32>,
      %c0_26 = arith.constant 0 : index
      %c0_27 = arith.constant 0 : index
      %56 = vector.load %arg7[%c0_26, %c0_27] : memref<32x1xf32, #tpu.memory_space<vmem>>, vector<32x1xf32>
      %cst_28 = arith.constant 1.000000e+00 : f32
      %cst_29 = arith.constant 0.000000e+00 : f32
      %57 = vector.broadcast %cst_28 : f32 to vector<32x128xf32>
      %58 = vector.broadcast %cst_29 : f32 to vector<32x128xf32>
      %59 = arith.select %46, %57, %58 : vector<32x128xi1>, vector<32x128xf32>
      %cst_30 = arith.constant dense<0.000000e+00> : vector<32xf32>
      %60 = vector.multi_reduction <add>, %59, %cst_30 [1] : vector<32x128xf32> to vector<32xf32>
      %61 = vector.shape_cast %60 : vector<32xf32> to vector<32x1xf32>
      %62 = arith.addf %56, %61 : vector<32x1xf32>
      %c0_31 = arith.constant 0 : index
      %c0_32 = arith.constant 0 : index
      %63 = vector.load %arg7[%c0_31, %c0_32] : memref<32x1xf32, #tpu.memory_space<vmem>>, vector<32x1xf32>
      tpu.vector_store %arg7[%c0_31, %c0_32], %62 {strides = array<i32>} : memref<32x1xf32, #tpu.memory_space<vmem>>, vector<32x1xf32>,
      %c0_33 = arith.constant 0 : index
      %c0_34 = arith.constant 0 : index
      %64 = vector.load %arg8[%c0_33, %c0_34] : memref<32x1xf32, #tpu.memory_space<vmem>>, vector<32x1xf32>
      %cst_35 = arith.constant dense<0.000000e+00> : vector<32xf32>
      %65 = vector.multi_reduction <add>, %48, %cst_35 [1] : vector<32x128xf32> to vector<32xf32>
      %66 = vector.shape_cast %65 : vector<32xf32> to vector<32x1xf32>
      %67 = arith.addf %64, %66 : vector<32x1xf32>
      %c0_36 = arith.constant 0 : index
      %c0_37 = arith.constant 0 : index
      %68 = vector.load %arg8[%c0_36, %c0_37] : memref<32x1xf32, #tpu.memory_space<vmem>>, vector<32x1xf32>
      tpu.vector_store %arg8[%c0_36, %c0_37], %67 {strides = array<i32>} : memref<32x1xf32, #tpu.memory_space<vmem>>, vector<32x1xf32>,
    } else {
    }
    %c0_i32_12 = arith.constant 0 : i32
    %25 = arith.cmpi eq, %arg2, %c0_i32_12 : i32
    %26 = arith.extui %25 : i1 to i32
    %c0_i32_13 = arith.constant 0 : i32
    %27 = arith.cmpi ne, %26, %c0_i32_13 : i32
    scf.if %27 {
      %c0_17 = arith.constant 0 : index
      %c0_18 = arith.constant 0 : index
      %33 = vector.load %arg7[%c0_17, %c0_18] : memref<32x1xf32, #tpu.memory_space<vmem>>, vector<32x1xf32>
      %cst_19 = arith.constant 0.000000e+00 : f32
      %34 = vector.broadcast %cst_19 : f32 to vector<32x1xf32>
      %35 = arith.cmpf ogt, %33, %34 : vector<32x1xf32>
      %c0_20 = arith.constant 0 : index
      %c0_21 = arith.constant 0 : index
      %36 = vector.load %arg9[%c0_20, %c0_21] : memref<32x1xf32, #tpu.memory_space<vmem>>, vector<32x1xf32>
      %c0_22 = arith.constant 0 : index
      %c0_23 = arith.constant 0 : index
      %37 = vector.load %arg6[%c0_22, %c0_23] : memref<32x1xf32, #tpu.memory_space<vmem>>, vector<32x1xf32>
      %cst_24 = arith.constant 1.000000e+00 : f32
      %38 = vector.broadcast %cst_24 : f32 to vector<32x1xf32>
      %39 = arith.select %35, %33, %38 : vector<32x1xi1>, vector<32x1xf32>
      %40 = arith.divf %37, %39 : vector<32x1xf32>
      %cst_25 = arith.constant 0.000000e+00 : f32
      %41 = vector.broadcast %cst_25 : f32 to vector<32x1xf32>
      %42 = arith.select %35, %40, %41 : vector<32x1xi1>, vector<32x1xf32>
      %43 = arith.addf %36, %42 : vector<32x1xf32>
      %c0_26 = arith.constant 0 : index
      %c0_27 = arith.constant 0 : index
      %44 = vector.load %arg9[%c0_26, %c0_27] : memref<32x1xf32, #tpu.memory_space<vmem>>, vector<32x1xf32>
      tpu.vector_store %arg9[%c0_26, %c0_27], %43 {strides = array<i32>} : memref<32x1xf32, #tpu.memory_space<vmem>>, vector<32x1xf32>,
      %c0_28 = arith.constant 0 : index
      %c0_29 = arith.constant 0 : index
      %45 = vector.load %arg10[%c0_28, %c0_29] : memref<32x1xf32, #tpu.memory_space<vmem>>, vector<32x1xf32>
      %cst_30 = arith.constant 1.000000e+00 : f32
      %cst_31 = arith.constant 0.000000e+00 : f32
      %46 = vector.broadcast %cst_30 : f32 to vector<32x1xf32>
      %47 = vector.broadcast %cst_31 : f32 to vector<32x1xf32>
      %48 = arith.select %35, %46, %47 : vector<32x1xi1>, vector<32x1xf32>
      %49 = arith.addf %45, %48 : vector<32x1xf32>
      %c0_32 = arith.constant 0 : index
      %c0_33 = arith.constant 0 : index
      %50 = vector.load %arg10[%c0_32, %c0_33] : memref<32x1xf32, #tpu.memory_space<vmem>>, vector<32x1xf32>
      tpu.vector_store %arg10[%c0_32, %c0_33], %49 {strides = array<i32>} : memref<32x1xf32, #tpu.memory_space<vmem>>, vector<32x1xf32>,
      %c0_34 = arith.constant 0 : index
      %c0_35 = arith.constant 0 : index
      %51 = vector.load %arg11[%c0_34, %c0_35] : memref<32x1xf32, #tpu.memory_space<vmem>>, vector<32x1xf32>
      %c0_36 = arith.constant 0 : index
      %c0_37 = arith.constant 0 : index
      %52 = vector.load %arg8[%c0_36, %c0_37] : memref<32x1xf32, #tpu.memory_space<vmem>>, vector<32x1xf32>
      %53 = arith.addf %51, %52 : vector<32x1xf32>
      %c0_38 = arith.constant 0 : index
      %c0_39 = arith.constant 0 : index
      %54 = vector.load %arg11[%c0_38, %c0_39] : memref<32x1xf32, #tpu.memory_space<vmem>>, vector<32x1xf32>
      tpu.vector_store %arg11[%c0_38, %c0_39], %53 {strides = array<i32>} : memref<32x1xf32, #tpu.memory_space<vmem>>, vector<32x1xf32>,
    } else {
    }
    %c0_i32_14 = arith.constant 0 : i32
    %28 = arith.cmpi eq, %arg1, %c0_i32_14 : i32
    %c0_i32_15 = arith.constant 0 : i32
    %29 = arith.cmpi eq, %arg2, %c0_i32_15 : i32
    %30 = arith.andi %28, %29 : i1
    %31 = arith.extui %30 : i1 to i32
    %c0_i32_16 = arith.constant 0 : i32
    %32 = arith.cmpi ne, %31, %c0_i32_16 : i32
    scf.if %32 {
      %c0_17 = arith.constant 0 : index
      %c0_18 = arith.constant 0 : index
      %33 = vector.load %arg9[%c0_17, %c0_18] : memref<32x1xf32, #tpu.memory_space<vmem>>, vector<32x1xf32>
      %34 = vector.shape_cast %33 : vector<32x1xf32> to vector<1x32x1xf32>
      %cst_19 = arith.constant dense<0.000000e+00> : vector<1xf32>
      %35 = vector.multi_reduction <add>, %34, %cst_19 [1, 2] : vector<1x32x1xf32> to vector<1xf32>
      %36 = vector.shape_cast %35 : vector<1xf32> to vector<1x1x1xf32>
      %37 = vector.extract %36[0, 0, 0] : f32 from vector<1x1x1xf32>
      %c0_20 = arith.constant 0 : index
      %c0_21 = arith.constant 0 : index
      %38 = vector.load %arg10[%c0_20, %c0_21] : memref<32x1xf32, #tpu.memory_space<vmem>>, vector<32x1xf32>
      %39 = vector.shape_cast %38 : vector<32x1xf32> to vector<1x32x1xf32>
      %cst_22 = arith.constant dense<0.000000e+00> : vector<1xf32>
      %40 = vector.multi_reduction <add>, %39, %cst_22 [1, 2] : vector<1x32x1xf32> to vector<1xf32>
      %41 = vector.shape_cast %40 : vector<1xf32> to vector<1x1x1xf32>
      %42 = vector.extract %41[0, 0, 0] : f32 from vector<1x1x1xf32>
      %c0_23 = arith.constant 0 : index
      %c0_24 = arith.constant 0 : index
      %43 = vector.load %arg11[%c0_23, %c0_24] : memref<32x1xf32, #tpu.memory_space<vmem>>, vector<32x1xf32>
      %44 = vector.shape_cast %43 : vector<32x1xf32> to vector<1x32x1xf32>
      %cst_25 = arith.constant dense<0.000000e+00> : vector<1xf32>
      %45 = vector.multi_reduction <add>, %44, %cst_25 [1, 2] : vector<1x32x1xf32> to vector<1xf32>
      %46 = vector.shape_cast %45 : vector<1xf32> to vector<1x1x1xf32>
      %47 = vector.extract %46[0, 0, 0] : f32 from vector<1x1x1xf32>
      %48 = tpu.iota {dimensions = array<i32: 1>} : vector<1x8x128xi32>
      %49 = tpu.iota {dimensions = array<i32: 2>} : vector<1x8x128xi32>
      %c0_i32_26 = arith.constant 0 : i32
      %50 = vector.broadcast %c0_i32_26 : i32 to vector<1x8x128xi32>
      %51 = arith.cmpi eq, %48, %50 : vector<1x8x128xi32>
      %c0_i32_27 = arith.constant 0 : i32
      %52 = vector.broadcast %c0_i32_27 : i32 to vector<1x8x128xi32>
      %53 = arith.cmpi eq, %49, %52 : vector<1x8x128xi32>
      %54 = arith.andi %51, %53 : vector<1x8x128xi1>
      %c1_i32_28 = arith.constant 1 : i32
      %55 = vector.broadcast %c1_i32_28 : i32 to vector<1x8x128xi32>
      %56 = arith.cmpi eq, %49, %55 : vector<1x8x128xi32>
      %57 = arith.andi %51, %56 : vector<1x8x128xi1>
      %c2_i32 = arith.constant 2 : i32
      %58 = vector.broadcast %c2_i32 : i32 to vector<1x8x128xi32>
      %59 = arith.cmpi eq, %49, %58 : vector<1x8x128xi32>
      %60 = arith.andi %51, %59 : vector<1x8x128xi1>
      %cst_29 = arith.constant 0.000000e+00 : f32
      %61 = vector.broadcast %47 : f32 to vector<1x8x128xf32>
      %62 = vector.broadcast %cst_29 : f32 to vector<1x8x128xf32>
      %63 = arith.select %60, %61, %62 : vector<1x8x128xi1>, vector<1x8x128xf32>
      %64 = vector.broadcast %42 : f32 to vector<1x8x128xf32>
      %65 = arith.select %57, %64, %63 : vector<1x8x128xi1>, vector<1x8x128xf32>
      %66 = vector.broadcast %37 : f32 to vector<1x8x128xf32>
      %67 = arith.select %54, %66, %65 : vector<1x8x128xi1>, vector<1x8x128xf32>
      %c0_30 = arith.constant 0 : index
      %c0_31 = arith.constant 0 : index
      %c0_32 = arith.constant 0 : index
      %68 = vector.load %arg5[%c0_30, %c0_31, %c0_32] : memref<1x8x128xf32, #tpu.memory_space<vmem>>, vector<1x8x128xf32>
      tpu.vector_store %arg5[%c0_30, %c0_31, %c0_32], %67 {strides = array<i32>} : memref<1x8x128xf32, #tpu.memory_space<vmem>>, vector<1x8x128xf32>,
    } else {
    }
    return
  }
  func.func @transform_0(%arg0: i32, %arg1: i32, %arg2: i32) -> (i32, i32) {
    %c1_i32 = arith.constant 1 : i32
    %0 = arith.muli %arg0, %c1_i32 : i32
    %1 = arith.addi %0, %arg1 : i32
    %c0_i32 = arith.constant 0 : i32
    %2 = arith.minsi %1, %c0_i32 : i32
    %c0_i32_0 = arith.constant 0 : i32
    return %2, %arg2 : i32, i32
  }
  func.func @transform_1(%arg0: i32, %arg1: i32, %arg2: i32) -> (i32, i32) {
    %c1_i32 = arith.constant 1 : i32
    %0 = arith.muli %arg0, %c1_i32 : i32
    %1 = arith.addi %0, %arg1 : i32
    %c0_i32 = arith.constant 0 : i32
    %2 = arith.minsi %1, %c0_i32 : i32
    %c0_i32_0 = arith.constant 0 : i32
    return %2, %arg2 : i32, i32
  }
  func.func @transform_2(%arg0: i32, %arg1: i32, %arg2: i32) -> (i32, i32, i32) {
    %c0_i32 = arith.constant 0 : i32
    %c0_i32_0 = arith.constant 0 : i32
    %c0_i32_1 = arith.constant 0 : i32
    return %arg0, %c0_i32, %c0_i32_0 : i32, i32, i32
  }
}

</mosaic_0001>

<bundles_post_ra>
// kernel: tpu_custom_call.1
= control target key start
LH: loop header
LB: loop body
LE: loop exit
PB: predicated region body
PF: predicated region fallthrough
CT: control target
= control target key end

     0   :  { %s723_s0 = inlined_call_operand.vmem [shape: f32[8,128], index: 0, kind: input, shape index: {}]   ;;  %s724_s1 = inlined_call_operand.vmem [shape: s32[8,128], index: 1, kind: input, shape index: {}]   ;;  %s725_s2 = inlined_call_operand.hbm [shape: f32[1,8,128], index: 2, kind: output, shape index: {}]  }
   0x1   :  { %v143_v0 = vld [vmem:[%s724_s1] sm:$0xff] }
   0x2   :  { %7 = vsyncpa [#allocation9], 0  ;;  %v557_v1 = vmov 0.0   ;;  %vm147_vm0 = vcmp.ne.s32.totalorder %v143_v0, 0  ;;  %vm102_vm1 = vcmask 7168   ;;  %v139_v3 = vld [vmem:[%s723_s0] sm:$0xff] }
   0x3   :  { %232 = vadd.xlane.f32.xlu1 %v557_v1  ;;  %v224_v2 = vsel %vm147_vm0, 1.0, %v557_v1  ;;  %125 = vst.msk [vmem:[#allocation3 + $0x10] sm:$0xff] %vm102_vm1, %v557_v1  ;;  %103 = vst.msk [vmem:[#allocation5] sm:$0xff] %vm102_vm1, %v557_v1  ;;  %v199_v4 = vsel %vm147_vm0, %v139_v3, 0.0  ;;  %s558_s14 = smov [#allocation8]  }
   0x4   :  { %228 = vadd.xlane.f32.xlu0 %v224_v2  ;;  %104 = vst.msk [vmem:[#allocation5 + $0x8] sm:$0xff] %vm102_vm1, %v557_v1  ;;  %105 = vst.msk [vmem:[#allocation5 + $0x10] sm:$0xff] %vm102_vm1, %v557_v1  ;;  %s499_s15 = sshll.u32 %s558_s14, 4  ;;  %s500_s15 = int_to_ptr.vmem [resolvable:$true] %s499_s15 }
   0x5   :  { %106 = vst.msk [vmem:[#allocation5 + $0x18] sm:$0xff] %vm102_vm1, %v557_v1  ;;  %107 = vst.msk [vmem:[#allocation6] sm:$0xff] %vm102_vm1, %v557_v1  ;;  %s535_s16 = scalar_lea.vmem %s500_s15, 128  ;;  %p540_p1 = scmp.lt.s32.totalorder %s500_s15, %s500_s15 }
   0x6   :  { %108 = vst.msk [vmem:[#allocation6 + $0x8] sm:$0xff] %vm102_vm1, %v557_v1  ;;  %109 = vst.msk [vmem:[#allocation6 + $0x10] sm:$0xff] %vm102_vm1, %v557_v1  ;;  %p536_p0 = scmp.ne.s32.totalorder %s500_s15, %s535_s16  ;;  %p541_p2 = scmp.lt.s32.totalorder %s535_s16, %s535_s16 }
   0x7   :  { %110 = vst.msk [vmem:[#allocation6 + $0x18] sm:$0xff] %vm102_vm1, %v557_v1  ;;  %111 = vst.msk [vmem:[#allocation7] sm:$0xff] %vm102_vm1, %v557_v1  ;;  %234 = vadd.xlane.f32.xlu1 %v557_v1 }
   0x8   :  { %112 = vst.msk [vmem:[#allocation7 + $0x8] sm:$0xff] %vm102_vm1, %v557_v1  ;;  %113 = vst.msk [vmem:[#allocation7 + $0x10] sm:$0xff] %vm102_vm1, %v557_v1  ;;  %230 = vadd.xlane.f32.xlu0 %v557_v1  ;;  %p542_p3 = por %p541_p2, %p540_p1 }
   0x9   :  { %114 = vst.msk [vmem:[#allocation7 + $0x18] sm:$0xff] %vm102_vm1, %v557_v1  ;;  %119 = vst.msk [vmem:[#allocation2] sm:$0xff] %vm102_vm1, %v557_v1 }
   0xa   :  { %120 = vst.msk [vmem:[#allocation2 + $0x8] sm:$0xff] %vm102_vm1, %v557_v1  ;;  %121 = vst.msk [vmem:[#allocation2 + $0x10] sm:$0xff] %vm102_vm1, %v557_v1  ;;  %v222_v5 = vld [vmem:[#allocation3 + $0x10] sm:$0xff]  ;;  %p543_p4 = pnand %p542_p3, %p536_p0 }
   0xb   :  { %122 = vst.msk [vmem:[#allocation2 + $0x18] sm:$0xff] %vm102_vm1, %v557_v1  ;;  %123 = vst.msk [vmem:[#allocation3] sm:$0xff] %vm102_vm1, %v557_v1  ;;  %205 = vadd.xlane.f32.xlu1 %v557_v1 }
   0xc   :  { %124 = vst.msk [vmem:[#allocation3 + $0x8] sm:$0xff] %vm102_vm1, %v557_v1  ;;  %126 = vst.msk [vmem:[#allocation3 + $0x18] sm:$0xff] %vm102_vm1, %v557_v1  ;;  %203 = vadd.xlane.f32.xlu0 %v199_v4  ;;  %v380_v29 = vld [vmem:[#allocation6] sm:$0xff]  ;;  %v349_v4 = vld [vmem:[#allocation5 + $0x10] sm:$0xff] }
   0xd   :  { %127 = vst.msk [vmem:[#allocation4] sm:$0xff] %vm102_vm1, %v557_v1  ;;  %128 = vst.msk [vmem:[#allocation4 + $0x8] sm:$0xff] %vm102_vm1, %v557_v1  ;;  %v382_v24 = vld [vmem:[#allocation6 + $0x10] sm:$0xff]  ;;  %v381_v45 = vld [vmem:[#allocation6 + $0x8] sm:$0xff] }
   0xe   :  { %129 = vst.msk [vmem:[#allocation4 + $0x10] sm:$0xff] %vm102_vm1, %v557_v1  ;;  %130 = vst.msk [vmem:[#allocation4 + $0x18] sm:$0xff] %vm102_vm1, %v557_v1  ;;  %v383_v39 = vld [vmem:[#allocation6 + $0x18] sm:$0xff]  ;;  %v396_v56 = vld [vmem:[#allocation7] sm:$0xff] }
   0xf   :  { %248 = vadd.xlane.f32.xlu1 %v139_v3 }
  0x10   :  { %207 = vadd.xlane.f32.xlu0 %v557_v1  ;;  %v195_v19 = vld [vmem:[#allocation2] sm:$0xff] }
  0x11   :  { %v196_v16 = vld [vmem:[#allocation2 + $0x8] sm:$0xff]  ;;  %v197_v31 = vld [vmem:[#allocation2 + $0x10] sm:$0xff] }
  0x12   :  { %v220_v7 = vld [vmem:[#allocation3] sm:$0xff]  ;;  %v198_v38 = vld [vmem:[#allocation2 + $0x18] sm:$0xff] }
  0x13   :  { %209 = vadd.xlane.f32.xlu1 %v557_v1  ;;  %v223_v10 = vld [vmem:[#allocation3 + $0x18] sm:$0xff]  ;;  %v221_v13 = vld [vmem:[#allocation3 + $0x8] sm:$0xff] }
  0x14   :  { %250 = vadd.xlane.f32.xlu0 %v557_v1  ;;  %v244_v23 = vld [vmem:[#allocation4] sm:$0xff]  ;;  %v245_v47 = vld [vmem:[#allocation4 + $0x8] sm:$0xff] }
  0x15   :  { %v247_v53 = vld [vmem:[#allocation4 + $0x18] sm:$0xff]  ;;  %v246_v57 = vld [vmem:[#allocation4 + $0x10] sm:$0xff] }
  0x17   :  { %254 = vadd.xlane.f32.xlu1 %v557_v1 }
  0x18   :  { %252 = vadd.xlane.f32.xlu0 %v557_v1 }
  0x8c   :  { %v233_v6 = vpop.xlane.xlu1 %232 }
  0x8d   :  { %v238_v8 = vadd.f32 %v233_v6, %v222_v5  ;;  %v229_v9 = vpop.xlane.xlu0 %228  ;;  %v397_v5 = vld [vmem:[#allocation7 + $0x8] sm:$0xff] }
  0x8e   :  { %v236_v11 = vadd.f32 %v229_v9, %v220_v7 }
  0x8f   :  { %242 = vst.msk [vmem:[#allocation3 + $0x10] sm:$0xff] %vm102_vm1, %v238_v8  ;;  %v399_v8 = vld [vmem:[#allocation7 + $0x18] sm:$0xff] }
  0x90   :  { %v235_v12 = vpop.xlane.xlu1 %234  ;;  %240 = vst.msk [vmem:[#allocation3] sm:$0xff] %vm102_vm1, %v236_v11 }
  0x91   :  { %v239_v14 = vadd.f32 %v235_v12, %v223_v10  ;;  %v231_v15 = vpop.xlane.xlu0 %230 }
  0x92   :  { %v237_v17 = vadd.f32 %v231_v15, %v221_v13  ;;  %v347_v15 = vld [vmem:[#allocation5] sm:$0xff] }
  0x93   :  { %243 = vst.msk [vmem:[#allocation3 + $0x18] sm:$0xff] %vm102_vm1, %v239_v14 }
  0x94   :  { %v206_v18 = vpop.xlane.xlu1 %205  ;;  %241 = vst.msk [vmem:[#allocation3 + $0x8] sm:$0xff] %vm102_vm1, %v237_v17 }
  0x95   :  { %v212_v20 = vadd.f32 %v206_v18, %v196_v16  ;;  %v204_v22 = vpop.xlane.xlu0 %203 }
  0x96   :  { %v644_v21 = vld [vmem:[#allocation3 + $0x10] sm:$0xff]  ;;  %v211_v25 = vadd.f32 %v204_v22, %v195_v19 }
  0x97   :  { %vm345_vm2 = vcmp.gt.f32.partialorder %v644_v21, 0.0  ;;  %217 = vst.msk [vmem:[#allocation2 + $0x8] sm:$0xff] %vm102_vm1, %v212_v20  ;;  %v654_v28 = vld [vmem:[#allocation3] sm:$0xff] }
  0x98   :  { %v357_v26 = vsel %vm345_vm2, %v644_v21, 1.0  ;;  %v386_v27 = vsel %vm345_vm2, 1.0, %v557_v1  ;;  %v249_v30 = vpop.xlane.xlu1 %248  ;;  %vm343_vm3 = vcmp.gt.f32.partialorder %v654_v28, 0.0  ;;  %216 = vst.msk [vmem:[#allocation2] sm:$0xff] %vm102_vm1, %v211_v25 }
  0x99   :  { %527 = vrcp.f32 %v357_v26  ;;  %v256_v32 = vadd.f32 %v249_v30, %v244_v23  ;;  %v390_v33 = vadd.f32 %v386_v27, %v382_v24  ;;  %v355_v34 = vsel %vm343_vm3, %v654_v28, 1.0  ;;  %v208_v37 = vpop.xlane.xlu0 %207  ;;  %v398_v23 = vld [vmem:[#allocation7 + $0x10] sm:$0xff] }
  0x9a   :  { %v384_v35 = vsel %vm343_vm3, 1.0, %v557_v1  ;;  %v664_v36 = vld [vmem:[#allocation3 + $0x18] sm:$0xff]  ;;  %529 = vrcp.f32 %v355_v34  ;;  %v213_v41 = vadd.f32 %v208_v37, %v197_v31 }
  0x9b   :  { %v388_v40 = vadd.f32 %v384_v35, %v380_v29  ;;  %vm346_vm4 = vcmp.gt.f32.partialorder %v664_v36, 0.0  ;;  %260 = vst.msk [vmem:[#allocation4] sm:$0xff] %vm102_vm1, %v256_v32  ;;  %394 = vst.msk [vmem:[#allocation6 + $0x10] sm:$0xff] %vm102_vm1, %v390_v33  ;;  %v675_v44 = vld [vmem:[#allocation3 + $0x8] sm:$0xff]  ;;  %v350_v31 = vld [vmem:[#allocation5 + $0x18] sm:$0xff] }
  0x9c   :  { %v358_v42 = vsel %vm346_vm4, %v664_v36, 1.0  ;;  %v387_v43 = vsel %vm346_vm4, 1.0, %v557_v1  ;;  %v210_v46 = vpop.xlane.xlu1 %209  ;;  %vm344_vm5 = vcmp.gt.f32.partialorder %v675_v44, 0.0  ;;  %218 = vst.msk [vmem:[#allocation2 + $0x10] sm:$0xff] %vm102_vm1, %v213_v41 }
  0x9d   :  { %392 = vst.msk [vmem:[#allocation6] sm:$0xff] %vm102_vm1, %v388_v40  ;;  %531 = vrcp.f32 %v358_v42  ;;  %v214_v48 = vadd.f32 %v210_v46, %v198_v38  ;;  %v391_v49 = vadd.f32 %v387_v43, %v383_v39  ;;  %v356_v50 = vsel %vm344_vm5, %v675_v44, 1.0  ;;  %v251_v52 = vpop.xlane.xlu0 %250  ;;  %v348_v38 = vld [vmem:[#allocation5 + $0x8] sm:$0xff] }
  0x9e   :  { %v385_v51 = vsel %vm344_vm5, 1.0, %v557_v1  ;;  %533 = vrcp.f32 %v356_v50  ;;  %v257_v55 = vadd.f32 %v251_v52, %v245_v47  ;;  %v352_v33 = vld [vmem:[#allocation2 + $0x8] sm:$0xff] }
  0x9f   :  { %v389_v54 = vadd.f32 %v385_v51, %v381_v45  ;;  %219 = vst.msk [vmem:[#allocation2 + $0x18] sm:$0xff] %vm102_vm1, %v214_v48  ;;  %395 = vst.msk [vmem:[#allocation6 + $0x18] sm:$0xff] %vm102_vm1, %v391_v49  ;;  %v351_v3 = vld [vmem:[#allocation2] sm:$0xff] }
  0xa0   :  { %v255_v58 = vpop.xlane.xlu1 %254  ;;  %261 = vst.msk [vmem:[#allocation4 + $0x8] sm:$0xff] %vm102_vm1, %v257_v55 }
  0xa1   :  { %393 = vst.msk [vmem:[#allocation6 + $0x8] sm:$0xff] %vm102_vm1, %v389_v54  ;;  %v259_v59 = vadd.f32 %v255_v58, %v247_v53  ;;  %v253_v61 = vpop.xlane.xlu0 %252 }
  0xa2   :  { %v400_v60 = vld [vmem:[#allocation4] sm:$0xff]  ;;  %v258_v63 = vadd.f32 %v253_v61, %v246_v57  ;;  %v437_v9 = vld [vmem:[#allocation6 + $0x10] sm:$0xff] }
  0xa3   :  { %v404_v62 = vadd.f32 %v400_v60, %v396_v56  ;;  %263 = vst.msk [vmem:[#allocation4 + $0x18] sm:$0xff] %vm102_vm1, %v259_v59  ;;  %v353_v0 = vld [vmem:[#allocation2 + $0x10] sm:$0xff]  ;;  %v442_v26 = vsel %vm102_vm1, %v437_v9, 0.0 }
  0xa4   :  { %262 = vst.msk [vmem:[#allocation4 + $0x10] sm:$0xff] %vm102_vm1, %v258_v63  ;;  %v435_v1 = vld [vmem:[#allocation6] sm:$0xff] }
  0xa5   :  { %408 = vst.msk [vmem:[#allocation7] sm:$0xff] %vm102_vm1, %v404_v62  ;;  %v439_v14 = vsel %vm102_vm1, %v435_v1, 0.0 }
  0xa6   :  { %v528_v2 = vpop.eup %527  ;;  %v354_v7 = vld [vmem:[#allocation2 + $0x18] sm:$0xff] }
  0xa7   :  { %v364_v6 = vmul.f32 %v528_v2, %v353_v0  ;;  %v530_v10 = vpop.eup %529  ;;  %v401_v11 = vld [vmem:[#allocation4 + $0x8] sm:$0xff]  ;;  %v438_v13 = vld [vmem:[#allocation6 + $0x18] sm:$0xff] }
  0xa8   :  { %v436_v12 = vld [vmem:[#allocation6 + $0x8] sm:$0xff]  ;;  %v360_v16 = vmul.f32 %v530_v10, %v351_v3  ;;  %v405_v18 = vadd.f32 %v401_v11, %v397_v5  ;;  %v444_v21 = vsel %vm102_vm1, %v438_v13, 0.0 }
  0xa9   :  { %v369_v17 = vsel %vm345_vm2, %v364_v6, 0.0  ;;  %v440_v19 = vsel %vm102_vm1, %v436_v12, 0.0 }
  0xaa   :  { %v532_v20 = vpop.eup %531  ;;  %v373_v22 = vadd.f32 %v369_v17, %v349_v4  ;;  %v403_v24 = vld [vmem:[#allocation4 + $0x18] sm:$0xff]  ;;  %v441_v25 = vadd.f32 %v440_v19, %v439_v14  ;;  %v367_v27 = vsel %vm343_vm3, %v360_v16, 0.0  ;;  %409 = vst.msk [vmem:[#allocation7 + $0x8] sm:$0xff] %vm102_vm1, %v405_v18 }
  0xab   :  { %v366_v29 = vmul.f32 %v532_v20, %v354_v7  ;;  %v407_v30 = vadd.f32 %v403_v24, %v399_v8  ;;  %v534_v32 = vpop.eup %533  ;;  %v371_v34 = vadd.f32 %v367_v27, %v347_v15  ;;  %v402_v35 = vld [vmem:[#allocation4 + $0x10] sm:$0xff]  ;;  %v475_v24 = vlaneseq }
  0xac   :  { %378 = vst.msk [vmem:[#allocation5 + $0x10] sm:$0xff] %vm102_vm1, %v373_v22  ;;  %v443_v37 = vadd.f32 %v442_v26, %v441_v25  ;;  %v362_v39 = vmul.f32 %v534_v32, %v352_v33  ;;  %v406_v40 = vadd.f32 %v402_v35, %v398_v23  ;;  %v455_v36 = vld [vmem:[#allocation7] sm:$0xff] }
  0xad   :  { %v370_v28 = vsel %vm346_vm4, %v366_v29, 0.0  ;;  %411 = vst.msk [vmem:[#allocation7 + $0x18] sm:$0xff] %vm102_vm1, %v407_v30  ;;  %376 = vst.msk [vmem:[#allocation5] sm:$0xff] %vm102_vm1, %v371_v34  ;;  %v459_v48 = vsel %vm102_vm1, %v455_v36, 0.0  ;;  %v476_v25 = vshrl.u32 %v475_v24, 7  ;;  %v478_v26 = vand.u32 127, %v475_v24 }
  0xae   :  { %v445_v41 = vadd.f32 %v444_v21, %v443_v37  ;;  %v374_v42 = vadd.f32 %v370_v28, %v350_v31  ;;  %v368_v43 = vsel %vm344_vm5, %v362_v39, 0.0  ;;  %410 = vst.msk [vmem:[#allocation7 + $0x10] sm:$0xff] %vm102_vm1, %v406_v40 }
  0xaf   :  { %v372_v45 = vadd.f32 %v368_v43, %v348_v38  ;;  %vm479_vm6 = vcmp.eq.s32.totalorder %v476_v25, 0  ;;  %vm484_vm7 = vcmp.eq.s32.totalorder %v478_v26, 2  ;;  %vm482_vm8 = vcmp.eq.s32.totalorder %v478_v26, 1 }
  0xb0   :  { %446 = vadd.xlane.f32.xlu1 %v445_v41  ;;  %379 = vst.msk [vmem:[#allocation5 + $0x18] sm:$0xff] %vm102_vm1, %v374_v42  ;;  %vm480_vm9 = vcmp.eq.s32.totalorder %v478_v26, 0  ;;  %vm485_vm10 = vmand %vm479_vm6, %vm484_vm7 }
  0xb1   :  { %377 = vst.msk [vmem:[#allocation5 + $0x8] sm:$0xff] %vm102_vm1, %v372_v45  ;;  %v456_v46 = vld [vmem:[#allocation7 + $0x8] sm:$0xff]  ;;  %vm483_vm11 = vmand %vm479_vm6, %vm482_vm8 }
  0xb2   :  { %v460_v49 = vsel %vm102_vm1, %v456_v46, 0.0  ;;  %vm481_vm12 = vmand %vm479_vm6, %vm480_vm9 }
  0xb3   :  { %v416_v51 = vld [vmem:[#allocation5 + $0x10] sm:$0xff]  ;;  %v461_v56 = vadd.f32 %v460_v49, %v459_v48 }
  0xb4   :  { %v414_v47 = vld [vmem:[#allocation5] sm:$0xff]  ;;  %v422_v57 = vsel %vm102_vm1, %v416_v51, 0.0  ;;  %v458_v60 = vld [vmem:[#allocation7 + $0x18] sm:$0xff] }
  0xb5   :  { %v457_v52 = vld [vmem:[#allocation7 + $0x10] sm:$0xff]  ;;  %v419_v44 = vsel %vm102_vm1, %v414_v47, 0.0  ;;  %v464_v0 = vsel %vm102_vm1, %v458_v60, 0.0 }
  0xb6   :  { %v462_v58 = vsel %vm102_vm1, %v457_v52, 0.0 }
  0xb7   :  { %v417_v54 = vld [vmem:[#allocation5 + $0x18] sm:$0xff]  ;;  %v463_v63 = vadd.f32 %v462_v58, %v461_v56 }
  0xb8   :  { %v415_v50 = vld [vmem:[#allocation5 + $0x8] sm:$0xff]  ;;  %v424_v61 = vsel %vm102_vm1, %v417_v54, 0.0 }
  0xb9   :  { %v420_v53 = vsel %vm102_vm1, %v415_v50, 0.0  ;;  %v465_v1 = vadd.f32 %v464_v0, %v463_v63 }
  0xba   :  { %v421_v55 = vadd.f32 %v420_v53, %v419_v44 }
  0xbc   :  { %v423_v59 = vadd.f32 %v422_v57, %v421_v55 }
  0xbe   :  { %v425_v62 = vadd.f32 %v424_v61, %v423_v59 }
  0xc0   :  { %426 = vadd.xlane.f32.xlu0 %v425_v62 }
  0xc4   :  { %466 = vadd.xlane.f32.xlu0 %v465_v1 }
 0x139   :  { %v447_v2 = vpop.xlane.xlu1 %446 }
 0x13a   :  { %v448_v3 = vrot.slane %v447_v2, 4 }
 0x13c   :  { %v449_v4 = vadd.f32 %v448_v3, %v447_v2 }
 0x13e   :  { %v450_v5 = vrot.slane %v449_v4, 2 }
 0x140   :  { %v451_v9 = vadd.f32 %v450_v5, %v449_v4 }
 0x142   :  { %v452_v15 = vrot.slane %v451_v9, 1 }
 0x144   :  { %v453_v20 = vadd.f32 %v452_v15, %v451_v9 }
 0x149   :  { %v427_v6 = vpop.xlane.xlu0 %426 }
 0x14a   :  { %v428_v7 = vrot.slane %v427_v6, 4 }
 0x14c   :  { %v429_v8 = vadd.f32 %v428_v7, %v427_v6 }
 0x14d   :  { %v467_v10 = vpop.xlane.xlu0 %466 }
 0x14e   :  { %v430_v11 = vrot.slane %v429_v8, 2  ;;  %v468_v12 = vrot.slane %v467_v10, 4 }
 0x150   :  { %v469_v13 = vadd.f32 %v468_v12, %v467_v10  ;;  %v431_v14 = vadd.f32 %v430_v11, %v429_v8 }
 0x152   :  { %v470_v16 = vrot.slane %v469_v13, 2  ;;  %v432_v17 = vrot.slane %v431_v14, 1 }
 0x154   :  { %v471_v18 = vadd.f32 %v470_v16, %v469_v13  ;;  %v433_v19 = vadd.f32 %v432_v17, %v431_v14 }
 0x156   :  { %519 = vpush %v433_v19  ;;  %v472_v22 = vrot.slane %v471_v18, 1 }
 0x157   :  { %521 = vpush %v453_v20 }
 0x158   :  { %v473_v23 = vadd.f32 %v472_v22, %v471_v18 }
 0x15a   :  { %523 = vpush %v473_v23 }
 0x187   :  { %s520_s0 = spop %519 }
 0x188   :  { %s522_s12 = spop %521  ;;  %v490_v21 = vstv %s520_s0 }
 0x189   :  { %v488_v29 = vstv %s522_s12 }
 0x18b   :  { %s524_s13 = spop %523 }
 0x18c   :  { %v486_v27 = vstv %s524_s13 }
 0x18d   :  { %v487_v30 = vsel %vm485_vm10, %v486_v27, 0.0 }
 0x18e   :  { %v489_v31 = vsel %vm483_vm11, %v488_v29, %v487_v30 }
 0x18f   :  { %v491_v32 = vsel %vm481_vm12, %v490_v21, %v489_v31 }
 0x190   :  { %492 = vst [vmem:[#allocation8] sm:$0xff] %v491_v32 }
 0x191   :  { %546 = shalt.err (!%p543_p4)
}
 0x192   :  { %502 = dma.vmem_to_hbm [thread:$0]  %s500_s15, 128, %s725_s2, [#allocation9]  }
 0x193   :  { %555 = dma.done.wait [#allocation9], 128  }
 0x194   :  { %556 = vsyncadd [#allocation9], 4294967168 }
 0x195   :  { %506 = vsyncpa [#allocation9], 1 }

</bundles_post_ra>
